<compile_context>
chip_gen: v5e
topology: v5e:2x2
jax: 0.10.0
libtpu: 0.0.40
codegen_flags: <defaults>
</compile_context>

<pallas_src>
import functools
import itertools

import jax
import jax.numpy as jnp
from jax.experimental import pallas as pl
from jax.experimental.pallas import tpu as pltpu


# --------------------------- VMEM / tiling helpers ---------------------------

def _vmem_capacity_bytes():
    try:
        info = pltpu.get_tpu_info()
        for name in ("vmem_capacity_bytes", "vmem_bytes", "vmem_size_bytes"):
            v = getattr(info, name, None)
            if v:
                return int(v)
    except Exception:
        pass
    return 64 * 1024 * 1024          # conservative fallback (v7x per-TC size)


_VMEM_CAP = _vmem_capacity_bytes()
# Scoped-VMEM limit handed to Mosaic: generous on v5e/v6e (128 MiB physical),
# automatically capped on v7x (64 MiB physical).
_VMEM_LIMIT = min(int(_VMEM_CAP * 3 // 4), 96 * 1024 * 1024)
# Budget used when picking tiles (double-buffered working set must fit here).
_TILE_BUDGET = _VMEM_LIMIT // 2


def _pick_tile(dim, max_tile, align):
    """Full dim if it fits, else the largest `align`-multiple divisor <= max_tile."""
    if dim <= max_tile:
        return dim
    t = (max_tile // align) * align
    while t >= align:
        if dim % t == 0:
            return t
        t -= align
    return dim  # full dim is always legal


def _tile_candidates(dim, align, cap):
    """Descending candidate tile sizes: divisors of `dim` that are align-aligned
    (plus the full dim itself, which is always a legal block)."""
    cands = []
    if dim <= cap:
        cands.append(dim)
    t = (cap // align) * align
    while t >= align:
        if t < dim and dim % t == 0 and t not in cands:
            cands.append(t)
        t -= align
    if dim not in cands:
        cands.append(dim)
    return cands


def _first_fit(cand_lists, bytes_fn, budget):
    """First tile combo under budget (lists are descending); else the smallest."""
    best, best_bytes = None, None
    for combo in itertools.product(*cand_lists):
        b = bytes_fn(*combo)
        if b <= budget:
            return combo
        if best_bytes is None or b < best_bytes:
            best, best_bytes = combo, b
    return best


# ------------------------------ matmul kernels -------------------------------

def _epilogue(y, act):
    if act == "gelu":
        # TODO(synk): RoBERTa uses exact erf GELU; tanh approximation (EUP) here.
        return jax.nn.gelu(y, approximate=True)
    if act == "tanh":
        return jnp.tanh(y)
    return y


def _linear_fullk_kernel(x_ref, w_ref, b_ref, o_ref, *, act):
    y = jnp.dot(x_ref[...], w_ref[...], preferred_element_type=jnp.float32)
    y = y + b_ref[...].astype(jnp.float32)
    o_ref[...] = _epilogue(y, act).astype(o_ref.dtype)


def _linear_acc_kernel(x_ref, w_ref, b_ref, o_ref, acc_ref, *, act):
    @pl.when(pl.program_id(2) == 0)
    def _():
        acc_ref[...] = jnp.zeros_like(acc_ref)

    acc_ref[...] += jnp.dot(x_ref[...], w_ref[...],
                            preferred_element_type=jnp.float32)

    @pl.when(pl.program_id(2) == pl.num_programs(2) - 1)
    def _():
        y = acc_ref[...] + b_ref[...].astype(jnp.float32)
        o_ref[...] = _epilogue(y, act).astype(o_ref.dtype)


def linear(x, w, b, act="none", out_dtype=jnp.bfloat16):
    """x: [M, K] bf16, w: [K, N] bf16, b: [N] f32 -> [M, N] out_dtype."""
    M, K = x.shape
    N = w.shape[1]
    osz = jnp.dtype(out_dtype).itemsize

    def nbytes(tk, tn, tm):
        byt = 2 * (2 * tm * tk + 2 * tk * tn + osz * tm * tn) + 2 * 4 * tn
        if tk < K:
            byt += 4 * tm * tn          # f32 accumulator scratch
        return byt

    tk, tn, tm = _first_fit(
        (_tile_candidates(K, 128, 4096),    # prefer full K -> no accumulator
         _tile_candidates(N, 128, 1024),
         _tile_candidates(M, 16, 512)),     # 16-row sublane align for bf16
        nbytes, _TILE_BUDGET)
    grid = (M // tm, N // tn, K // tk)
    full_k = grid[2] == 1

    kernel = functools.partial(
        _linear_fullk_kernel if full_k else _linear_acc_kernel, act=act)
    scratch = [] if full_k else [pltpu.VMEM((tm, tn), jnp.float32)]
    bytes_accessed = int(x.size * 2 + w.size * 2 + b.size * 4 + M * N * osz)
    return pl.pallas_call(
        kernel,
        out_shape=jax.ShapeDtypeStruct((M, N), out_dtype),
        grid_spec=pltpu.PrefetchScalarGridSpec(
            num_scalar_prefetch=0, grid=grid,
            in_specs=[
                pl.BlockSpec((tm, tk), lambda i, j, k: (i, k)),
                pl.BlockSpec((tk, tn), lambda i, j, k: (k, j)),
                pl.BlockSpec((1, tn), lambda i, j, k: (0, j)),
            ],
            out_specs=pl.BlockSpec((tm, tn), lambda i, j, k: (i, j)),
            scratch_shapes=scratch),
        compiler_params=pltpu.CompilerParams(
            dimension_semantics=("parallel", "parallel", "arbitrary"),
            vmem_limit_bytes=_VMEM_LIMIT),
        cost_estimate=pl.CostEstimate(flops=2 * M * N * K, transcendentals=0,
                                      bytes_accessed=bytes_accessed),
    )(x, w, b.reshape(1, N))


def _qkv_fullk_kernel(x_ref, w_ref, b_ref, o_ref):
    y = jnp.dot(x_ref[...], w_ref[0], preferred_element_type=jnp.float32)
    o_ref[0, 0, :, :] = (y + b_ref[0].astype(jnp.float32)).astype(o_ref.dtype)


def _qkv_acc_kernel(x_ref, w_ref, b_ref, o_ref, acc_ref):
    @pl.when(pl.program_id(2) == 0)
    def _():
        acc_ref[...] = jnp.zeros_like(acc_ref)

    acc_ref[...] += jnp.dot(x_ref[...], w_ref[0],
                            preferred_element_type=jnp.float32)

    @pl.when(pl.program_id(2) == pl.num_programs(2) - 1)
    def _():
        o_ref[0, 0, :, :] = (acc_ref[...] + b_ref[0].astype(jnp.float32)
                             ).astype(o_ref.dtype)


def qkv_projection(x, wqkv, bqkv, *, batch, seq):
    """Fused QKV projection writing q/k/v pre-split: out [3, B, S, H] bf16.

    x: [B*S, H] bf16; wqkv: [3, H, H] bf16 (1/sqrt(dh) folded into wqkv[0]);
    bqkv: [3, 1, H] f32.  The pre-split output layout lets attention read Q/V
    in place, killing the per-layer XLA head split/merge transposes.
    """
    M, K = x.shape
    H = wqkv.shape[2]

    def nbytes(tk, tn, tm):
        byt = 2 * (2 * tm * tk + 2 * tk * tn + 2 * tm * tn) + 2 * 4 * tn
        if tk < K:
            byt += 4 * tm * tn
        return byt

    tk, tn, tm = _first_fit(
        (_tile_candidates(K, 128, 4096),
         _tile_candidates(H, 128, 1024),   # tn divides H (per-q/k/v lane blocks)
         _tile_candidates(seq, 16, 512)),  # tm divides S (rows stay in one batch)
        nbytes, _TILE_BUDGET)
    njb = H // tn
    nsb = seq // tm
    grid = (M // tm, 3 * njb, K // tk)
    full_k = grid[2] == 1

    kernel = _qkv_fullk_kernel if full_k else _qkv_acc_kernel
    scratch = [] if full_k else [pltpu.VMEM((tm, tn), jnp.float32)]
    return pl.pallas_call(
        kernel,
        out_shape=jax.ShapeDtypeStruct((3, batch, seq, H), jnp.bfloat16),
        grid_spec=pltpu.PrefetchScalarGridSpec(
            num_scalar_prefetch=0, grid=grid,
            in_specs=[
                pl.BlockSpec((tm, tk), lambda i, j, k: (i, k)),
                pl.BlockSpec((1, tk, tn), lambda i, j, k: (j // njb, k, j % njb)),
                pl.BlockSpec((1, 1, tn), lambda i, j, k: (j // njb, 0, j % njb)),
            ],
            out_specs=pl.BlockSpec(
                (1, 1, tm, tn),
                lambda i, j, k: (j // njb, i // nsb, i % nsb, j % njb)),
            scratch_shapes=scratch),
        compiler_params=pltpu.CompilerParams(
            dimension_semantics=("parallel", "parallel", "arbitrary"),
            vmem_limit_bytes=_VMEM_LIMIT),
        cost_estimate=pl.CostEstimate(
            flops=2 * M * 3 * H * K, transcendentals=0,
            bytes_accessed=int(2 * M * K + 6 * K * H + 12 * H + 6 * M * H)),
    )(x, wqkv, bqkv)


def _linear_res_ln_fullk_kernel(x_ref, w_ref, b_ref, r_ref, g_ref, bt_ref,
                                o_ref, *, eps):
    y = jnp.dot(x_ref[...], w_ref[...], preferred_element_type=jnp.float32)
    y = y + b_ref[...].astype(jnp.float32) + r_ref[...].astype(jnp.float32)
    mean = jnp.mean(y, axis=-1, keepdims=True)
    c = y - mean
    var = jnp.mean(c * c, axis=-1, keepdims=True)
    o_ref[...] = (c * jax.lax.rsqrt(var + eps) * g_ref[...]
                  + bt_ref[...]).astype(o_ref.dtype)


def _linear_res_ln_acc_kernel(x_ref, w_ref, b_ref, r_ref, g_ref, bt_ref,
                              o_ref, acc_ref, *, eps):
    @pl.when(pl.program_id(1) == 0)
    def _():
        acc_ref[...] = jnp.zeros_like(acc_ref)

    acc_ref[...] += jnp.dot(x_ref[...], w_ref[...],
                            preferred_element_type=jnp.float32)

    @pl.when(pl.program_id(1) == pl.num_programs(1) - 1)
    def _():
        y = (acc_ref[...] + b_ref[...].astype(jnp.float32)
             + r_ref[...].astype(jnp.float32))
        mean = jnp.mean(y, axis=-1, keepdims=True)
        c = y - mean
        var = jnp.mean(c * c, axis=-1, keepdims=True)
        o_ref[...] = (c * jax.lax.rsqrt(var + eps) * g_ref[...]
                      + bt_ref[...]).astype(o_ref.dtype)


def linear_residual_layernorm(x, w, b, res, g, beta, eps=1e-5,
                              out_dtype=jnp.bfloat16):
    """LayerNorm(x @ w + b + res) over the last dim (output keeps full width N)."""
    M, K = x.shape
    N = w.shape[1]

    def nbytes(tk, tm):
        byt = 2 * (2 * tm * tk + 2 * tk * N + 4 * tm * N) + 6 * 4 * N
        if tk < K:
            byt += 4 * tm * N
        return byt

    tk, tm = _first_fit(
        (_tile_candidates(K, 128, 4096), _tile_candidates(M, 16, 512)),
        nbytes, _TILE_BUDGET)
    grid = (M // tm, K // tk)
    full_k = grid[1] == 1

    kernel = functools.partial(
        _linear_res_ln_fullk_kernel if full_k else _linear_res_ln_acc_kernel,
        eps=eps)
    scratch = [] if full_k else [pltpu.VMEM((tm, N), jnp.float32)]
    bytes_accessed = int(x.size * 2 + w.size * 2 + res.size * 2 + 3 * N * 4
                         + M * N * 2)
    return pl.pallas_call(
        kernel,
        out_shape=jax.ShapeDtypeStruct((M, N), out_dtype),
        grid_spec=pltpu.PrefetchScalarGridSpec(
            num_scalar_prefetch=0, grid=grid,
            in_specs=[
                pl.BlockSpec((tm, tk), lambda i, k: (i, k)),
                pl.BlockSpec((tk, N), lambda i, k: (k, 0)),
                pl.BlockSpec((1, N), lambda i, k: (0, 0)),
                pl.BlockSpec((tm, N), lambda i, k: (i, 0)),
                pl.BlockSpec((1, N), lambda i, k: (0, 0)),
                pl.BlockSpec((1, N), lambda i, k: (0, 0)),
            ],
            out_specs=pl.BlockSpec((tm, N), lambda i, k: (i, 0)),
            scratch_shapes=scratch),
        compiler_params=pltpu.CompilerParams(
            dimension_semantics=("parallel", "arbitrary"),
            vmem_limit_bytes=_VMEM_LIMIT),
        cost_estimate=pl.CostEstimate(flops=2 * M * N * K, transcendentals=0,
                                      bytes_accessed=bytes_accessed),
    )(x, w, b.reshape(1, N), res, g.reshape(1, N), beta.reshape(1, N))


def _layernorm_kernel(x_ref, g_ref, b_ref, o_ref, *, eps):
    x = x_ref[...].astype(jnp.float32)
    mean = jnp.mean(x, axis=-1, keepdims=True)
    c = x - mean
    var = jnp.mean(c * c, axis=-1, keepdims=True)
    o_ref[...] = (c * jax.lax.rsqrt(var + eps) * g_ref[...]
                  + b_ref[...]).astype(o_ref.dtype)


def layernorm(x, g, b, eps=1e-5, out_dtype=jnp.bfloat16):
    """Tiled LayerNorm over the last dim.  x: [M, H]."""
    M, H = x.shape
    tm = _pick_tile(M, 1024, 16)
    return pl.pallas_call(
        functools.partial(_layernorm_kernel, eps=eps),
        out_shape=jax.ShapeDtypeStruct((M, H), out_dtype),
        grid_spec=pltpu.PrefetchScalarGridSpec(
            num_scalar_prefetch=0, grid=(M // tm,),
            in_specs=[
                pl.BlockSpec((tm, H), lambda i: (i, 0)),
                pl.BlockSpec((1, H), lambda i: (0, 0)),
                pl.BlockSpec((1, H), lambda i: (0, 0)),
            ],
            out_specs=pl.BlockSpec((tm, H), lambda i: (i, 0))),
        compiler_params=pltpu.CompilerParams(
            dimension_semantics=("parallel",),
            vmem_limit_bytes=_VMEM_LIMIT),
    )(x, g.reshape(1, H), b.reshape(1, H))


# ----------------------------- attention kernels -----------------------------

def _attn_softmax_kernel(q_ref, kt_ref, v_ref, bias_ref, o_ref, *,
                         num_heads, head_dim):
    """Single-kv-step attention (S <= tkv): no online-softmax machinery."""
    dh = head_dim
    q = q_ref[0, 0]                  # (tq, H) bf16; 1/sqrt(dh) folded into wq
    v = v_ref[0, 0]                  # (tkv, H) bf16
    bias = bias_ref[0]               # (1, tkv) f32 additive mask
    for h in range(num_heads):       # static unroll: all heads per grid step
        s = jnp.dot(q[:, h * dh:(h + 1) * dh], kt_ref[0, h],
                    preferred_element_type=jnp.float32) + bias   # (tq, tkv)
        m = jnp.max(s, axis=-1, keepdims=True)
        p = jnp.exp(s - m)
        inv_l = pl.reciprocal(jnp.sum(p, axis=-1, keepdims=True), approx=True)
        o_h = jnp.dot(p.astype(v.dtype), v[:, h * dh:(h + 1) * dh],
                      preferred_element_type=jnp.float32)
        o_ref[0, :, h * dh:(h + 1) * dh] = (o_h * inv_l).astype(o_ref.dtype)


def _attn_flash_kernel(q_ref, kt_ref, v_ref, bias_ref, o_ref,
                       m_sc, l_sc, acc_sc, *, num_heads, head_dim):
    """Multi-kv-step flash attention (online softmax, per-head scratch)."""
    dh = head_dim
    ki = pl.program_id(2)

    @pl.when(ki == 0)
    def _():
        m_sc[...] = jnp.full_like(m_sc, -jnp.inf)
        l_sc[...] = jnp.zeros_like(l_sc)
        acc_sc[...] = jnp.zeros_like(acc_sc)

    q = q_ref[0, 0]
    v = v_ref[0, 0]
    bias = bias_ref[0]
    for h in range(num_heads):
        s = jnp.dot(q[:, h * dh:(h + 1) * dh], kt_ref[0, h],
                    preferred_element_type=jnp.float32) + bias
        m_prev = m_sc[h]
        m_new = jnp.maximum(m_prev, jnp.max(s, axis=-1, keepdims=True))
        alpha = jnp.exp(m_prev - m_new)
        p = jnp.exp(s - m_new)
        l_sc[h, :, :] = alpha * l_sc[h] + jnp.sum(p, axis=-1, keepdims=True)
        acc_sc[h, :, :] = alpha * acc_sc[h] + jnp.dot(
            p.astype(v.dtype), v[:, h * dh:(h + 1) * dh],
            preferred_element_type=jnp.float32)
        m_sc[h, :, :] = m_new

    @pl.when(ki == pl.num_programs(2) - 1)
    def _():
        for h in range(num_heads):
            inv_l = pl.reciprocal(l_sc[h], approx=True)
            o_ref[0, :, h * dh:(h + 1) * dh] = (acc_sc[h] * inv_l
                                                ).astype(o_ref.dtype)


def attention(qkv3, kt, bias, *, num_heads, head_dim):
    """qkv3: [3, B, S, H] bf16 (Q/V read in place); kt: [B, nH, dh, S] bf16;
    bias: [B, 1, S] f32.  Output written directly in [B, S, H] layout."""
    _, B, S, H = qkv3.shape
    tq = _pick_tile(S, 256, 16)
    tkv = _pick_tile(S, 512, 128)
    n_kv = S // tkv
    grid = (B, S // tq, n_kv)     # B and S//tq are even in practice -> clean
                                  # 2-TC megacore sharding on v7x.

    in_specs = [
        pl.BlockSpec((1, 1, tq, H), lambda b, qi, ki: (0, b, qi, 0)),    # Q
        pl.BlockSpec((1, num_heads, head_dim, tkv),
                     lambda b, qi, ki: (b, 0, 0, ki)),                   # K^T
        pl.BlockSpec((1, 1, tkv, H), lambda b, qi, ki: (2, b, ki, 0)),   # V
        pl.BlockSpec((1, 1, tkv), lambda b, qi, ki: (b, 0, ki)),         # mask
    ]
    out_spec = pl.BlockSpec((1, tq, H), lambda b, qi, ki: (b, qi, 0))

    if n_kv == 1:
        kernel = functools.partial(_attn_softmax_kernel,
                                   num_heads=num_heads, head_dim=head_dim)
        scratch = []
    else:
        kernel = functools.partial(_attn_flash_kernel,
                                   num_heads=num_heads, head_dim=head_dim)
        scratch = [pltpu.VMEM((num_heads, tq, 1), jnp.float32),
                   pltpu.VMEM((num_heads, tq, 1), jnp.float32),
                   pltpu.VMEM((num_heads, tq, head_dim), jnp.float32)]

    bytes_accessed = int(3 * B * S * H * 2 + B * S * 4 + B * S * H * 2)
    return pl.pallas_call(
        kernel,
        out_shape=jax.ShapeDtypeStruct((B, S, H), jnp.bfloat16),
        grid_spec=pltpu.PrefetchScalarGridSpec(
            num_scalar_prefetch=0, grid=grid,
            in_specs=in_specs, out_specs=out_spec, scratch_shapes=scratch),
        compiler_params=pltpu.CompilerParams(
            dimension_semantics=("parallel", "parallel", "arbitrary"),
            vmem_limit_bytes=_VMEM_LIMIT),
        cost_estimate=pl.CostEstimate(
            flops=4 * B * num_heads * S * S * head_dim,
            transcendentals=B * num_heads * S * S,
            bytes_accessed=bytes_accessed),
    )(qkv3, kt, qkv3, bias)


# ------------------------------ parameter init --------------------------------

def init_params(key, *, vocab, max_pos, hidden, num_layers, num_heads,
                intermediate, num_classes):
    def nrm(k, shape, std=0.02, dtype=jnp.float32):
        return (std * jax.random.normal(k, shape)).astype(dtype)

    H, I = hidden, intermediate
    dh = H // num_heads
    q_scale = 1.0 / (dh ** 0.5)
    n_pad = max(128, ((num_classes + 127) // 128) * 128)  # lane-dense classifier
    keys = iter(jax.random.split(key, 16 + num_layers * 8))

    fc1 = nrm(next(keys), (H, num_classes))
    fc1 = jnp.pad(fc1, ((0, 0), (0, n_pad - num_classes))).astype(jnp.bfloat16)

    params = {
        "word_emb": nrm(next(keys), (vocab, H), dtype=jnp.bfloat16),
        "pos_emb": nrm(next(keys), (max_pos, H), dtype=jnp.bfloat16),
        "type_emb": nrm(next(keys), (1, H), dtype=jnp.bfloat16),
        "emb_ln_g": jnp.ones((H,), jnp.float32),
        "emb_ln_b": jnp.zeros((H,), jnp.float32),
        "pool_w": nrm(next(keys), (H, H), dtype=jnp.bfloat16),
        "pool_b": jnp.zeros((H,), jnp.float32),
        "fc1_w": fc1,                               # [H, n_pad], zero-padded cols
        "fc1_b": jnp.zeros((n_pad,), jnp.float32),
        "layers": [],
    }
    for _ in range(num_layers):
        wq = nrm(next(keys), (H, H)) * q_scale      # fold 1/sqrt(dh) into Q proj
        wk = nrm(next(keys), (H, H))
        wv = nrm(next(keys), (H, H))
        layer = {
            "wqkv": jnp.stack([wq, wk, wv]).astype(jnp.bfloat16),   # [3, H, H]
            "bqkv": jnp.zeros((3, 1, H), jnp.float32),
            "wo": nrm(next(keys), (H, H), dtype=jnp.bfloat16),
            "bo": jnp.zeros((H,), jnp.float32),
            "ln1_g": jnp.ones((H,), jnp.float32),
            "ln1_b": jnp.zeros((H,), jnp.float32),
            "wi": nrm(next(keys), (H, I), dtype=jnp.bfloat16),
            "bi": jnp.zeros((I,), jnp.float32),
            "wf": nrm(next(keys), (I, H), dtype=jnp.bfloat16),
            "bf": jnp.zeros((H,), jnp.float32),
            "ln2_g": jnp.ones((H,), jnp.float32),
            "ln2_b": jnp.zeros((H,), jnp.float32),
        }
        params["layers"].append(layer)
    return params


# ------------------------------- forward pass ---------------------------------

def phobert_encoder(params, ids, masks, *, num_heads):
    """Returns (sequence_output [B,S,H] bf16, pooled_output [B,H] bf16)."""
    B, S = ids.shape
    H = params["word_emb"].shape[1]
    dh = H // num_heads

    # Embeddings (gather + sum stay in XLA glue; tables are bf16 to halve HBM).
    # TODO(synk): RoBERTa offsets position ids by padding_idx+1; plain 0..S-1 here.
    x = (params["word_emb"][ids]
         + params["pos_emb"][:S][None, :, :]
         + params["type_emb"][0][None, None, :])
    x = layernorm(x.reshape(B * S, H), params["emb_ln_g"], params["emb_ln_b"])

    # Tiny [B, 1, S] additive mask bias; broadcast over heads/queries in-kernel.
    bias = ((1.0 - masks.astype(jnp.float32)) * -1e9).reshape(B, 1, S)

    for layer in params["layers"]:
        # Fused QKV, written pre-split as [3, B, S, H] -> no head split/merge.
        qkv3 = qkv_projection(x, layer["wqkv"], layer["bqkv"], batch=B, seq=S)
        # Single per-layer layout pass: K pre-transposed to [B, nH, dh, S] so
        # the in-kernel QK^T is MXU-natural ((tq, dh) @ (dh, tkv)).
        kt = qkv3[1].reshape(B, S, num_heads, dh).transpose(0, 2, 3, 1)
        attn = attention(qkv3, kt, bias, num_heads=num_heads, head_dim=dh)

        # o-proj + bias + residual + LayerNorm fused in one kernel.
        x = linear_residual_layernorm(attn.reshape(B * S, H), layer["wo"],
                                      layer["bo"], x,
                                      layer["ln1_g"], layer["ln1_b"])
        # FFN: up-proj + GELU fused epilogue; down-proj + residual + LN fused.
        h = linear(x, layer["wi"], layer["bi"], act="gelu")
        x = linear_residual_layernorm(h, layer["wf"], layer["bf"],
                                      x, layer["ln2_g"], layer["ln2_b"])

    seq = x.reshape(B, S, H)
    cls = seq[:, 0, :]
    pool = linear(cls, params["pool_w"], params["pool_b"], act="tanh")
    return seq, pool


def phobert_classifier(params, ids, masks, *, num_heads, num_classes):
    """PhoBert.forward((ids, masks)) -> logits [B, num_classes] f32."""
    _, pool = phobert_encoder(params, ids, masks, num_heads=num_heads)
    z = pool  # Dropout(p=0.5) is identity in eval mode.
    # TODO(synk): stochastic dropout mask (pltpu.prng_*) for training mode.
    logits = linear(z, params["fc1_w"], params["fc1_b"], out_dtype=jnp.float32)
    return logits[:, :num_classes]   # strip lane padding


# ----------------------------------- main --------------------------------------

if __name__ == "__main__":
    VOCAB = 100
    MAX_POS = 16
    HIDDEN = 32          # stands in for phobert.config.hidden_size (=768)
    NUM_LAYERS = 2
    NUM_HEADS = 4
    INTERMEDIATE = 64
    NUM_CLASSES = 5
    B, S = 2, 8

    key = jax.random.PRNGKey(0)
    k_param, k_ids = jax.random.split(key)
    params = init_params(
        k_param, vocab=VOCAB, max_pos=MAX_POS, hidden=HIDDEN,
        num_layers=NUM_LAYERS, num_heads=NUM_HEADS,
        intermediate=INTERMEDIATE, num_classes=NUM_CLASSES)

    ids = jax.random.randint(k_ids, (B, S), 0, VOCAB, dtype=jnp.int32)
    masks = jnp.concatenate(
        [jnp.ones((B, S - 2), jnp.int32), jnp.zeros((B, 2), jnp.int32)], axis=1)

    logits = phobert_classifier(params, ids, masks,
                                num_heads=NUM_HEADS, num_classes=NUM_CLASSES)
    jax.block_until_ready(logits)
    assert logits.shape == (B, NUM_CLASSES) and logits.dtype == jnp.float32
    assert bool(jnp.all(jnp.isfinite(logits)))
    print("KERNEL_OK")
</pallas_src>

<mosaic_0001>
module attributes {stable_mosaic.version = 11 : i64} {
  func.func @_layernorm_kernel(%arg0: i32, %arg1: memref<16x32xbf16, #tpu.memory_space<vmem>>, %arg2: memref<1x32xf32, #tpu.memory_space<vmem>>, %arg3: memref<1x32xf32, #tpu.memory_space<vmem>>, %arg4: memref<16x32xbf16, #tpu.memory_space<vmem>>) attributes {dimension_semantics = [#tpu.dimension_semantics<parallel>], iteration_bounds = array<i64: 1>, scalar_prefetch = 0 : i64, scratch_operands = 0 : i64, tpu.core_type = #tpu.core_type<tc>, window_params = [{transform_indices = @transform_0, window_bounds = array<i64: 16, 32>}, {pipeline_mode = #tpu.pipeline_mode<synchronous>, transform_indices = @transform_1, window_bounds = array<i64: 1, 32>}, {pipeline_mode = #tpu.pipeline_mode<synchronous>, transform_indices = @transform_2, window_bounds = array<i64: 1, 32>}, {transform_indices = @transform_3, window_bounds = array<i64: 16, 32>}]} {
    %c0 = arith.constant 0 : index
    %c0_0 = arith.constant 0 : index
    %0 = vector.load %arg1[%c0, %c0_0] : memref<16x32xbf16, #tpu.memory_space<vmem>>, vector<16x32xbf16>
    %1 = arith.extf %0 : vector<16x32xbf16> to vector<16x32xf32>
    %cst = arith.constant dense<0.000000e+00> : vector<16xf32>
    %2 = vector.multi_reduction <add>, %1, %cst [1] : vector<16x32xf32> to vector<16xf32>
    %3 = vector.shape_cast %2 : vector<16xf32> to vector<16x1xf32>
    %cst_1 = arith.constant 3.200000e+01 : f32
    %4 = vector.broadcast %cst_1 : f32 to vector<16x1xf32>
    %5 = arith.divf %3, %4 : vector<16x1xf32>
    %6 = vector.broadcast %5 : vector<16x1xf32> to vector<16x32xf32>
    %7 = arith.subf %1, %6 : vector<16x32xf32>
    %8 = arith.mulf %7, %7 : vector<16x32xf32>
    %cst_2 = arith.constant dense<0.000000e+00> : vector<16xf32>
    %9 = vector.multi_reduction <add>, %8, %cst_2 [1] : vector<16x32xf32> to vector<16xf32>
    %10 = vector.shape_cast %9 : vector<16xf32> to vector<16x1xf32>
    %cst_3 = arith.constant 3.200000e+01 : f32
    %11 = vector.broadcast %cst_3 : f32 to vector<16x1xf32>
    %12 = arith.divf %10, %11 : vector<16x1xf32>
    %cst_4 = arith.constant 9.99999974E-6 : f32
    %13 = vector.broadcast %cst_4 : f32 to vector<16x1xf32>
    %14 = arith.addf %12, %13 : vector<16x1xf32>
    %15 = math.rsqrt %14 : vector<16x1xf32>
    %16 = vector.broadcast %15 : vector<16x1xf32> to vector<16x32xf32>
    %17 = arith.mulf %7, %16 : vector<16x32xf32>
    %c0_5 = arith.constant 0 : index
    %c0_6 = arith.constant 0 : index
    %18 = vector.load %arg2[%c0_5, %c0_6] : memref<1x32xf32, #tpu.memory_space<vmem>>, vector<1x32xf32>
    %19 = vector.broadcast %18 : vector<1x32xf32> to vector<16x32xf32>
    %20 = arith.mulf %17, %19 : vector<16x32xf32>
    %c0_7 = arith.constant 0 : index
    %c0_8 = arith.constant 0 : index
    %21 = vector.load %arg3[%c0_7, %c0_8] : memref<1x32xf32, #tpu.memory_space<vmem>>, vector<1x32xf32>
    %22 = vector.broadcast %21 : vector<1x32xf32> to vector<16x32xf32>
    %23 = arith.addf %20, %22 : vector<16x32xf32>
    %24 = arith.truncf %23 : vector<16x32xf32> to vector<16x32xbf16>
    %c0_9 = arith.constant 0 : index
    %c0_10 = arith.constant 0 : index
    %25 = vector.load %arg4[%c0_9, %c0_10] : memref<16x32xbf16, #tpu.memory_space<vmem>>, vector<16x32xbf16>
    tpu.vector_store %arg4[%c0_9, %c0_10], %24 {strides = array<i32>} : memref<16x32xbf16, #tpu.memory_space<vmem>>, vector<16x32xbf16>,
    return
  }
  func.func @transform_0(%arg0: i32) -> (i32, i32) {
    %c0_i32 = arith.constant 0 : i32
    %c0_i32_0 = arith.constant 0 : i32
    return %arg0, %c0_i32 : i32, i32
  }
  func.func @transform_1(%arg0: i32) -> (i32, i32) {
    %c0_i32 = arith.constant 0 : i32
    %c0_i32_0 = arith.constant 0 : i32
    %c0_i32_1 = arith.constant 0 : i32
    return %c0_i32, %c0_i32_0 : i32, i32
  }
  func.func @transform_2(%arg0: i32) -> (i32, i32) {
    %c0_i32 = arith.constant 0 : i32
    %c0_i32_0 = arith.constant 0 : i32
    %c0_i32_1 = arith.constant 0 : i32
    return %c0_i32, %c0_i32_0 : i32, i32
  }
  func.func @transform_3(%arg0: i32) -> (i32, i32) {
    %c0_i32 = arith.constant 0 : i32
    %c0_i32_0 = arith.constant 0 : i32
    return %arg0, %c0_i32 : i32, i32
  }
}

</mosaic_0001>

<bundles_post_ra>
// kernel: tpu_custom_call.1
= control target key start
LH: loop header
LB: loop body
LE: loop exit
PB: predicated region body
PF: predicated region fallthrough
CT: control target
= control target key end

     0   :  { %8 = vsyncpa [#allocation3], 0  ;;  %s282_s0 = inlined_call_operand.hbm [shape: bf16[16,32], index: 0, kind: input, shape index: {}]   ;;  %s283_s1 = inlined_call_operand.hbm [shape: f32[1,32], index: 1, kind: input, shape index: {}]   ;;  %s284_s2 = inlined_call_operand.vmem [shape: f32[1,32], index: 2, kind: input, shape index: {}]   ;;  %s285_s3 = inlined_call_operand.hbm [shape: bf16[16,32], index: 3, kind: output, shape index: {}]  }
   0x1   :  { %9 = vsyncpa [#allocation6], 0 }
   0x2   :  { %10 = vsyncpa [#allocation4], 0  ;;  %s15_s14 = sshll.u32 %s282_s0, 4  ;;  %s234_s15 = smov [#allocation2]   ;;  %s16_s14 = int_to_ptr.hbm [resolvable:$true] %s15_s14 }
   0x3   :  { %s17_s16 = sshll.u32 %s234_s15, 4  ;;  %s29_s19 = sshll.u32 %s283_s1, 4  ;;  %s18_s16 = int_to_ptr.vmem [resolvable:$true] %s17_s16  ;;  %s30_s19 = int_to_ptr.hbm [resolvable:$true] %s29_s19 }
   0x4   :  { %s235_s20 = smov 64   ;;  %s236_s21 = smov 4  }
   0x5   :  { %23 = dma.hbm_to_vmem [thread:$0]  %s16_s14, 128, %s18_s16, [#allocation3], %s235_s20, %s235_s20, %s236_s21  }
   0x6   :  { %s237_s22 = smov [#allocation5]  }
   0x7   :  { %s31_s23 = sshll.u32 %s237_s22, 4  ;;  %s32_s23 = int_to_ptr.vmem [resolvable:$true] %s31_s23 }
   0x8   :  { %34 = dma.hbm_to_vmem [thread:$0]  %s30_s19, 16, %s32_s23, [#allocation6]  }
   0x9   :  { %228 = dma.done.wait [#allocation3], 128  }
   0xa   :  { %229 = vsyncadd [#allocation3], 4294967168 }
   0xb   :  { %230 = dma.done.wait [#allocation6], 16  }
   0xc   :  { %231 = vsyncadd [#allocation6], 4294967280  ;;  %v139_v0 = vld [vmem:[#allocation2] sm:$0xff]   ;;  %vm49_vm0 = vcmask 261120   ;;  %v238_v5 = vmov 32.0   ;;  %vm115_vm7 = vcmask 257024  }
   0xd   :  { %v140_v1 = vunpack.c.l.bf16 %v139_v0  ;;  %v141_v3 = vunpack.c.h.bf16 %v139_v0  ;;  %150 = vrcp.f32 %v238_v5  ;;  %v148_v36 = vld [vmem:[#allocation5] ss:$0 sm:$0xff]  ;;  %v149_v40 = vld [vmem:[%s284_s2] ss:$0 sm:$0xff]  ;;  %s239_s24 = smov [#allocation7]   ;;  %s124_s2 = sshll.u32 %s285_s3, 4  ;;  %s125_s2 = int_to_ptr.hbm [resolvable:$true] %s124_s2 }
   0xe   :  { %s122_s25 = sshll.u32 %s239_s24, 4  ;;  %s123_s25 = int_to_ptr.vmem [resolvable:$true] %s122_s25 }
   0xf   :  { %v50_v2 = vsel %vm49_vm0, %v140_v1, 0.0  ;;  %v53_v4 = vsel %vm49_vm0, %v141_v3, 0.0 }
  0x10   :  { %51 = vadd.xlane.f32.xlu0 %v50_v2 }
  0x13   :  { %v151_v6 = vpop.eup %150 }
  0x14   :  { %v57_v7 = vmul.f32 32.0, %v151_v6  ;;  %vm61_vm1 = vweird.f32 %v151_v6 }
  0x16   :  { %v58_v8 = vsub.f32 1.0, %v57_v7 }
  0x18   :  { %54 = vadd.xlane.f32.xlu0 %v53_v4  ;;  %v59_v9 = vmul.f32 %v151_v6, %v58_v8 }
  0x1a   :  { %v60_v10 = vadd.f32 %v151_v6, %v59_v9 }
  0x1c   :  { %v62_v11 = vsel %vm61_vm1, %v151_v6, %v60_v10 }
  0x83   :  { %v52_v12 = vpop.xlane.xlu0 %51 }
  0x84   :  { %v63_v13 = vmul.f32 %v62_v11, %v52_v12 }
  0x86   :  { %v65_v14 = vsub.f32 %v140_v1, %v63_v13 }
  0x88   :  { %v67_v15 = vmul.f32 %v65_v14, %v65_v14 }
  0x8a   :  { %v69_v16 = vsel %vm49_vm0, %v67_v15, 0.0 }
  0x8b   :  { %70 = vadd.xlane.f32.xlu1 %v69_v16  ;;  %v55_v17 = vpop.xlane.xlu0 %54 }
  0x8c   :  { %v64_v18 = vmul.f32 %v62_v11, %v55_v17 }
  0x8e   :  { %v66_v19 = vsub.f32 %v141_v3, %v64_v18 }
  0x90   :  { %v68_v20 = vmul.f32 %v66_v19, %v66_v19 }
  0x92   :  { %v72_v21 = vsel %vm49_vm0, %v68_v20, 0.0 }
  0x93   :  { %73 = vadd.xlane.f32.xlu1 %v72_v21 }
  0xfe   :  { %v71_v22 = vpop.xlane.xlu1 %70 }
  0xff   :  { %v75_v23 = vmul.f32 %v71_v22, %v62_v11 }
 0x101   :  { %v77_v24 = vadd.f32 1e-05, %v75_v23 }
 0x103   :  { %152 = vrsqrt.f32 %v77_v24  ;;  %vm85_vm3 = vweird.f32 %v77_v24 }
 0x106   :  { %v74_v25 = vpop.xlane.xlu1 %73 }
 0x107   :  { %v76_v26 = vmul.f32 %v74_v25, %v62_v11 }
 0x109   :  { %v153_v27 = vpop.eup %152  ;;  %v78_v28 = vadd.f32 1e-05, %v76_v26 }
 0x10a   :  { %v80_v29 = vmul.f32 %v153_v27, %v77_v24  ;;  %vm86_vm2 = vweird.f32 %v153_v27 }
 0x10b   :  { %154 = vrsqrt.f32 %v78_v28  ;;  %vm87_vm4 = vmor %vm85_vm3, %vm86_vm2  ;;  %vm95_vm6 = vweird.f32 %v78_v28 }
 0x10c   :  { %v81_v30 = vmul.f32 %v153_v27, %v80_v29 }
 0x10e   :  { %v82_v31 = vmul.f32 0.5, %v81_v30 }
 0x110   :  { %v83_v32 = vsub.f32 1.5, %v82_v31 }
 0x111   :  { %v155_v33 = vpop.eup %154 }
 0x112   :  { %v84_v34 = vmul.f32 %v153_v27, %v83_v32  ;;  %v90_v35 = vmul.f32 %v155_v33, %v78_v28  ;;  %vm96_vm5 = vweird.f32 %v155_v33 }
 0x113   :  { %vm97_vm8 = vmor %vm95_vm6, %vm96_vm5 }
 0x114   :  { %v88_v37 = vsel %vm87_vm4, %v153_v27, %v84_v34  ;;  %v91_v38 = vmul.f32 %v155_v33, %v90_v35 }
 0x115   :  { %v99_v39 = vmul.f32 %v88_v37, %v65_v14 }
 0x116   :  { %v92_v41 = vmul.f32 0.5, %v91_v38 }
 0x117   :  { %v105_v42 = vmul.f32 %v148_v36, %v99_v39 }
 0x118   :  { %v93_v43 = vsub.f32 1.5, %v92_v41 }
 0x119   :  { %v111_v44 = vadd.f32 %v149_v40, %v105_v42 }
 0x11a   :  { %v94_v45 = vmul.f32 %v155_v33, %v93_v43 }
 0x11b   :  { %v113_v46 = vpack.c.bf16 %v111_v44, %v111_v44 }
 0x11c   :  { %v98_v47 = vsel %vm97_vm8, %v155_v33, %v94_v45 }
 0x11d   :  { %v100_v48 = vmul.f32 %v98_v47, %v66_v19  ;;  %116 = vst.msk [vmem:[#allocation7] sm:$0xf] %vm115_vm7, %v113_v46 }
 0x11f   :  { %v106_v49 = vmul.f32 %v148_v36, %v100_v48 }
 0x121   :  { %v112_v50 = vadd.f32 %v149_v40, %v106_v49 }
 0x123   :  { %v114_v51 = vpack.c.bf16 %v112_v50, %v112_v50 }
 0x125   :  { %117 = vst.msk [vmem:[#allocation7 + $0x4] sm:$0xf] %vm115_vm7, %v114_v51 }
 0x126   :  { %130 = dma.vmem_to_hbm [thread:$0]  %s123_s25, 128, %s125_s2, [#allocation4], %s235_s20, %s235_s20, %s236_s21  }
 0x127   :  { %232 = dma.done.wait [#allocation4], 128  }
 0x128   :  { %233 = vsyncadd [#allocation4], 4294967168 }
 0x129   :  { %135 = vsyncpa [#allocation3], 1 }
 0x12a   :  { %136 = vsyncpa [#allocation6], 1 }
 0x12b   :  { %137 = vsyncpa [#allocation4], 1 }

</bundles_post_ra>
